<compile_context>
chip_gen: v7x
topology: tpu7x:2x2x1
jax: 0.10.0
libtpu: 0.0.40
codegen_flags: <defaults>
</compile_context>

<pallas_src>
import jax
import jax.numpy as jnp
from jax.experimental import pallas as pl
from jax.experimental.pallas import tpu as pltpu


# ---------------------------------------------------------------------------
# Kernel: one fused linear (folded W1/W2) over a row tile of flattened tokens.
# ---------------------------------------------------------------------------
def _one_word_linear_probe_kernel(x_ref, w_ref, b_ref, out_ref):
  """x_ref: (tm, H)  w_ref: (H, L)  b_ref: (1, L)  out_ref: (tm, L)."""
  logits = jnp.dot(x_ref[...], w_ref[...],
                   preferred_element_type=jnp.float32) + b_ref[...]
  out_ref[...] = logits.astype(out_ref.dtype)


# ---------------------------------------------------------------------------
# Tiling helpers
# ---------------------------------------------------------------------------
def _round_up(x, m):
  return ((x + m - 1) // m) * m


# Padded VMEM footprint per row ~ 512 B (x, lanes padded to 128) + 512 B (out).
# Double-buffered:  tm * 2 KiB.  tm = 2048 -> 4 MiB, safe on v5e's 16 MiB
# scoped default and trivially on v6e/v7x.
_TM_CAP = 2048


def _choose_tm(bs):
  if bs <= 1024:
    # Genuinely small problem: one grid step, rows padded to a sublane multiple.
    return _round_up(max(bs, 8), 8)
  # Large problem: largest tile under the VMEM-derived cap, but always >= 2
  # programs so v7x's two TensorCores both get work on the "parallel" axis.
  return min(_TM_CAP, _round_up(pl.cdiv(bs, 2), 128))


# ---------------------------------------------------------------------------
# Wrapper
# ---------------------------------------------------------------------------
def one_word_linear_label_probe(batch, params):
  """Pallas implementation of OneWordLinearLabelProbe.forward (eval mode).

  Args:
    batch: (B, S, H) float32 word representations.
    params: dict with W1 (R, H), b1 (R,), W2 (L, R), b2 (L,)
            (PyTorch nn.Linear conventions: y = x @ W^T + b).
  Returns:
    (B, S, L) float32 logits.
  """
  B, S, H = batch.shape
  W1 = jnp.asarray(params["W1"], jnp.float32)     # (R, H)
  W2 = jnp.asarray(params["W2"], jnp.float32)     # (L, R)
  b1 = jnp.asarray(params["b1"], jnp.float32)     # (R,)
  b2 = jnp.asarray(params["b2"], jnp.float32)     # (L,)
  L = W2.shape[0]
  BS = B * S

  # TODO(synk): dropout is treated as identity (eval mode); training-time
  # stochastic dropout is not implemented in the kernel.

  # Fold the two linears (valid because dropout==identity):
  #   logits = (x @ W1^T + b1) @ W2^T + b2 = x @ (W1^T @ W2^T) + (b1 @ W2^T + b2)
  w_eff = (W1.T @ W2.T).astype(jnp.float32)               # (H, L)
  b_eff = (b1 @ W2.T + b2).reshape(1, L).astype(jnp.float32)

  # Flatten (B, S, H) -> (B*S, H): the probe is per-token, so batch and
  # sequence collapse into one row axis (one big matmul stream).
  x2d = jnp.asarray(batch, jnp.float32).reshape(BS, H)

  tm = _choose_tm(BS)
  bs_pad = _round_up(BS, tm)
  if bs_pad != BS:
    x2d = jnp.pad(x2d, ((0, bs_pad - BS), (0, 0)))
  grid = (bs_pad // tm,)

  full = lambda shape: pl.BlockSpec(shape, lambda i: (0,) * len(shape))

  cost = pl.CostEstimate(
      flops=2 * BS * H * L + BS * L,
      transcendentals=0,
      bytes_accessed=4 * (BS * H + H * L + L + BS * L),
  )

  out2d = pl.pallas_call(
      _one_word_linear_probe_kernel,
      out_shape=jax.ShapeDtypeStruct((bs_pad, L), jnp.float32),
      grid_spec=pltpu.PrefetchScalarGridSpec(
          num_scalar_prefetch=0,
          grid=grid,
          in_specs=[
              pl.BlockSpec((tm, H), lambda i: (i, 0)),   # x row tile (streams)
              full((H, L)),                              # folded weight (resident)
              full((1, L)),                              # folded bias  (resident)
          ],
          out_specs=pl.BlockSpec((tm, L), lambda i: (i, 0)),
      ),
      compiler_params=pltpu.CompilerParams(
          dimension_semantics=("parallel",)),
      cost_estimate=cost,
  )(x2d, w_eff, b_eff)

  return out2d[:BS].reshape(B, S, L)


# ---------------------------------------------------------------------------
# Pure-JAX reference (mirrors the PyTorch forward, dropout == identity)
# ---------------------------------------------------------------------------
def _reference(batch, params):
  h = batch @ params["W1"].T + params["b1"]
  return h @ params["W2"].T + params["b2"]


# ---------------------------------------------------------------------------
# Main
# ---------------------------------------------------------------------------
if __name__ == "__main__":
  # Small shapes consistent with the module:
  #   batch=2, max_seq_len=8, hidden_dim=32, maximum_rank=16,
  #   label_space_size=8.
  B, S, H, R, L = 2, 8, 32, 16, 8

  key = jax.random.PRNGKey(0)
  k_x, k1, kb1, k2, kb2 = jax.random.split(key, 5)

  # Deterministic parameter init (PyTorch nn.Linear-style uniform bounds).
  def uni(k, shape, fan_in):
    bound = 1.0 / jnp.sqrt(fan_in)
    return jax.random.uniform(k, shape, jnp.float32, -bound, bound)

  params = {
      "W1": uni(k1, (R, H), H),     # linear1: hidden_dim -> maximum_rank
      "b1": uni(kb1, (R,), H),
      "W2": uni(k2, (L, R), R),     # linear2: maximum_rank -> label_space
      "b2": uni(kb2, (L,), R),
  }

  x = jax.random.normal(k_x, (B, S, H), jnp.float32)

  out = one_word_linear_label_probe(x, params)
  out = jax.block_until_ready(out)

  ref = _reference(x, params)
  assert out.shape == (B, S, L), out.shape
  assert jnp.allclose(out, ref, atol=1e-5, rtol=1e-5), \
      f"max abs diff {jnp.max(jnp.abs(out - ref))}"

  print("KERNEL_OK")
</pallas_src>

<mosaic_0001>
module attributes {stable_mosaic.version = 11 : i64} {
  func.func @_one_word_linear_probe_kernel(%arg0: i32, %arg1: memref<16x32xf32, #tpu.memory_space<vmem>>, %arg2: memref<32x8xf32, #tpu.memory_space<vmem>>, %arg3: memref<1x8xf32, #tpu.memory_space<vmem>>, %arg4: memref<16x8xf32, #tpu.memory_space<vmem>>) attributes {dimension_semantics = [#tpu.dimension_semantics<parallel>], iteration_bounds = array<i64: 1>, scalar_prefetch = 0 : i64, scratch_operands = 0 : i64, tpu.core_type = #tpu.core_type<tc>, window_params = [{transform_indices = @transform_0, window_bounds = array<i64: 16, 32>}, {pipeline_mode = #tpu.pipeline_mode<synchronous>, transform_indices = @transform_1, window_bounds = array<i64: 32, 8>}, {pipeline_mode = #tpu.pipeline_mode<synchronous>, transform_indices = @transform_2, window_bounds = array<i64: 1, 8>}, {transform_indices = @transform_3, window_bounds = array<i64: 16, 8>}]} {
    %c0 = arith.constant 0 : index
    %c0_0 = arith.constant 0 : index
    %0 = vector.load %arg1[%c0, %c0_0] : memref<16x32xf32, #tpu.memory_space<vmem>>, vector<16x32xf32>
    %c0_1 = arith.constant 0 : index
    %c0_2 = arith.constant 0 : index
    %1 = vector.load %arg2[%c0_1, %c0_2] : memref<32x8xf32, #tpu.memory_space<vmem>>, vector<32x8xf32>
    %cst = arith.constant dense<0.000000e+00> : vector<16x8xf32>
    %2 = tpu.matmul %0, %1, %cst {dimension_numbers = #tpu.dot_dimension_numbers<[1], [0], [0], [1], [0, 0, 1, 1], [], []>} : vector<16x32xf32>, vector<32x8xf32>, vector<16x8xf32> -> vector<16x8xf32>
    %c0_3 = arith.constant 0 : index
    %c0_4 = arith.constant 0 : index
    %3 = vector.load %arg3[%c0_3, %c0_4] : memref<1x8xf32, #tpu.memory_space<vmem>>, vector<1x8xf32>
    %4 = vector.broadcast %3 : vector<1x8xf32> to vector<16x8xf32>
    %5 = arith.addf %2, %4 : vector<16x8xf32>
    %c0_5 = arith.constant 0 : index
    %c0_6 = arith.constant 0 : index
    %6 = vector.load %arg4[%c0_5, %c0_6] : memref<16x8xf32, #tpu.memory_space<vmem>>, vector<16x8xf32>
    tpu.vector_store %arg4[%c0_5, %c0_6], %5 {strides = array<i32>} : memref<16x8xf32, #tpu.memory_space<vmem>>, vector<16x8xf32>,
    return
  }
  func.func @transform_0(%arg0: i32) -> (i32, i32) {
    %c0_i32 = arith.constant 0 : i32
    %c0_i32_0 = arith.constant 0 : i32
    return %arg0, %c0_i32 : i32, i32
  }
  func.func @transform_1(%arg0: i32) -> (i32, i32) {
    %c0_i32 = arith.constant 0 : i32
    %c0_i32_0 = arith.constant 0 : i32
    %c0_i32_1 = arith.constant 0 : i32
    return %c0_i32, %c0_i32_0 : i32, i32
  }
  func.func @transform_2(%arg0: i32) -> (i32, i32) {
    %c0_i32 = arith.constant 0 : i32
    %c0_i32_0 = arith.constant 0 : i32
    %c0_i32_1 = arith.constant 0 : i32
    return %c0_i32, %c0_i32_0 : i32, i32
  }
  func.func @transform_3(%arg0: i32) -> (i32, i32) {
    %c0_i32 = arith.constant 0 : i32
    %c0_i32_0 = arith.constant 0 : i32
    return %arg0, %c0_i32 : i32, i32
  }
}

</mosaic_0001>

<bundles_post_ra>
// kernel: tpu_custom_call.1
= control target key start
LH: loop header
LB: loop body
LE: loop exit
PB: predicated region body
PF: predicated region fallthrough
CT: control target
= control target key end

     0   :  { %vm27_vm0 = vcmask 261120   ;;  %vm109_vm1 = vcmask 64512   ;;  %s191_s1 = inlined_call_operand.vmem [shape: f32[32,8], index: 1, kind: input, shape index: {}]   ;;  %s192_s0 = inlined_call_operand.vmem [shape: f32[16,32], index: 0, kind: input, shape index: {}]   ;;  %s193_s2 = inlined_call_operand.vmem [shape: f32[1,8], index: 2, kind: input, shape index: {}]   ;;  %s194_s3 = inlined_call_operand.vmem [shape: f32[16,8], index: 3, kind: output, shape index: {}]  }
   0x1   :  { %v16_v0 = vld [vmem:[%s191_s1] sm:$0xff]  ;;  %v17_v1 = vld [vmem:[%s191_s1 + $0x8] sm:$0xff]  ;;  %v18_v2 = vld [vmem:[%s191_s1 + $0x10] sm:$0xff] }
   0x2   :  { %v136_v3 = vpack.c.bf16 %v17_v1, %v16_v0  ;;  %v19_v4 = vld [vmem:[%s191_s1 + $0x18] sm:$0xff]  ;;  %v14_v5 = vld [vmem:[%s192_s0] sm:$0xff]  ;;  %v15_v7 = vld [vmem:[%s192_s0 + $0x8] sm:$0xff] }
   0x3   :  { %v140_v6 = vpack.c.bf16 %v19_v4, %v18_v2  ;;  %133 = vmatprep.mubr.msk.f32.mxu0 %vm27_vm0, %v14_v5  ;;  %v116_v8 = vld [vmem:[%s193_s2] ss:$0 sm:$0xff] }
   0x4   :  { %137 = vmatprep.subr.bf16.mxu0 %v136_v3 }
   0x5   :  { %139 = vmatpush3.bf16.msra.mxu0 %v136_v3 }
   0x6   :  { %141 = vmatprep.subr.bf16.mxu0 %v140_v6 }
   0x9   :  { %143 = vmatpush3.bf16.msra.mxu0 %v140_v6 }
   0xc   :  { %134 = vmatmul.mubr.msk.f32.vlgmr.msra.gmra.mrb[0].mxu0 %vm27_vm0, %v15_v7 }
  0xdf   :  { %v135_v9 = vpop.f32.mrb[0].mxu0 }
  0xe0   :  { %v106_v10 = vadd.f32 %v135_v9, %v116_v8  ;;  %v100_v11 = vpop.f32.mrb[1].mxu0 }
  0xe1   :  { %v101_v12 = vadd.f32 %v116_v8, %v100_v11 }
  0xe2   :  { %111 = vst.msk [vmem:[%s194_s3 + $0x8] sm:$0xff] %vm109_vm1, %v106_v10 }
  0xe3   :  { %110 = vst.msk [vmem:[%s194_s3] sm:$0xff] %vm109_vm1, %v101_v12 }

</bundles_post_ra>
